<compile_context>
chip_gen: v5e
topology: v5e:2x2
jax: 0.10.0
libtpu: 0.0.40
codegen_flags: <defaults>
</compile_context>

<pallas_src>
import functools

import jax
import jax.numpy as jnp
from jax import lax
from jax.experimental import pallas as pl
from jax.experimental.pallas import tpu as pltpu

EPS = 1e-5


def residual_block_kernel(x_ref, w1_ref, w2_ref, g1_ref, be1_ref,
                          g2_ref, be2_ref, a_ref, out_ref, *,
                          N, C_pad, H, W):
    """Residual block on one lane-dense (N*C_pad, H*W) tile.

    x_ref   : (NCp, HW)       f32   rows = n*C_pad + c, lanes = flat (h, w)
    w*_ref  : (NCp, 9*NCp)    bf16  block-diagonal conv weights
                                    Wmat[n*C_pad+co, tap*NCp + n*C_pad+ci] = w[co, tap, ci]
    g*,be*  : (NCp, 1)        f32   BatchNorm gamma / beta (tiled per batch row)
    a_ref   : (1,)            f32   PReLU slope (SMEM scalar)
    out_ref : (NCp, HW)       f32
    """
    NCp = N * C_pad
    HW = H * W
    inv_cnt = 1.0 / (N * H * W)            # BN count per channel = N*H*W

    # ---- per-tap border masks, built once from a lane iota (no mask DMA) ----
    lane = lax.broadcasted_iota(jnp.int32, (1, HW), 1)
    if (W & (W - 1)) == 0:                  # power-of-two W: pure bitwise ops
        wi = lane & (W - 1)
        hi = lane >> (W.bit_length() - 1)
    else:
        wi = lane % W
        hi = lane // W
    taps = []                               # (lane shift, validity mask or None)
    for dy in range(3):
        for dx in range(3):
            oy, ox = dy - 1, dx - 1
            shift = oy * W + ox
            if oy == 0 and ox == 0:
                taps.append((shift, None))  # center tap: always valid
            else:
                hh = hi + oy
                ww = wi + ox
                valid = (hh >= 0) & (hh < H) & (ww >= 0) & (ww < W)
                taps.append((shift, valid))

    def conv3x3(y, w_ref):
        # Build the tap-major im2col (9*NCp, HW) and run ONE MXU dot (K = 9*NCp).
        # Each tap is a static XLU lane rotation; out-of-image positions are zeroed.
        # Rows are per-image, so wrapped reads are exactly the masked-out ones.
        blocks = []
        for shift, valid in taps:
            shifted = y if shift == 0 else pltpu.roll(y, (-shift) % HW, axis=1)
            blocks.append(shifted if valid is None
                          else jnp.where(valid, shifted, 0.0))
        col = jnp.concatenate(blocks, axis=0).astype(jnp.bfloat16)  # cast at build
        # bf16 operands, f32 accumulation.  Conv bias intentionally omitted: it is a
        # per-channel constant removed exactly by the BN mean subtraction below.
        return jnp.dot(w_ref[...], col, preferred_element_type=jnp.float32)

    def batchnorm(y, g_ref, be_ref):
        # Training-mode BN (biased variance).  Lane-reduce per row (XLU), then a
        # tiny static combine across the N batch row-blocks of each channel.
        s = jnp.sum(y, axis=1, keepdims=True)        # (NCp, 1)
        ss = jnp.sum(y * y, axis=1, keepdims=True)   # (NCp, 1)
        tot_s = s[0:C_pad]
        tot_ss = ss[0:C_pad]
        for n in range(1, N):
            tot_s = tot_s + s[n * C_pad:(n + 1) * C_pad]
            tot_ss = tot_ss + ss[n * C_pad:(n + 1) * C_pad]
        mean = tot_s * inv_cnt                                    # (C_pad, 1)
        var = jnp.maximum(tot_ss * inv_cnt - mean * mean, 0.0)    # clamp f32 cancel
        inv_std = lax.rsqrt(var + EPS)
        mean_r = jnp.concatenate([mean] * N, axis=0) if N > 1 else mean
        inv_r = jnp.concatenate([inv_std] * N, axis=0) if N > 1 else inv_std
        scale = g_ref[...] * inv_r                                # (NCp, 1)
        shift = be_ref[...] - mean_r * scale
        return y * scale + shift                                  # single FMA

    x = x_ref[...]
    alpha = a_ref[0]

    h = batchnorm(conv3x3(x, w1_ref), g1_ref, be1_ref)
    h = jnp.where(h > 0, h, h * alpha)               # PReLU, single shared slope
    h = batchnorm(conv3x3(h, w2_ref), g2_ref, be2_ref)

    out_ref[...] = x + h                             # lane-dense (HW) store


@jax.jit
def residual_block_nchw(x_nchw, params):
    """PyTorch-convention wrapper: NCHW in / NCHW out.  No transposes anywhere."""
    w1, b1, g1, be1, w2, b2, g2, be2, a = params     # b1/b2 cancel through BN
    N, C, H, W = x_nchw.shape
    HW = H * W
    # Layout assumptions (demo shape N=2, C=4, H=W=16 satisfies both).
    assert HW % 128 == 0, "flattened spatial axis should be a multiple of 128 lanes"

    # Pad C so that N*C_pad is a whole number of f32 sublane groups (multiple of 8).
    C_pad = C
    while (N * C_pad) % 8 != 0:
        C_pad += 1
    NCp = N * C_pad

    # (N, C, H, W) -> (N*C_pad, H*W): contiguous, free reshape (pad is a no-op here).
    x2d = jnp.pad(x_nchw.astype(jnp.float32),
                  ((0, 0), (0, C_pad - C), (0, 0), (0, 0))).reshape(NCp, HW)

    def blockdiag(w):
        # w: (C_out, 9, C_in) tap-major ->  (NCp, 9*NCp) block-diagonal bf16 matrix.
        w_p = jnp.pad(w.astype(jnp.float32),
                      ((0, C_pad - C), (0, 0), (0, C_pad - C)))   # (C_pad, 9, C_pad)
        eye = jnp.eye(N, dtype=jnp.float32)
        wm = jnp.einsum('mn,otc->motnc', eye, w_p)                # (N,Cp,9,N,Cp)
        return wm.reshape(NCp, 9 * NCp).astype(jnp.bfloat16)

    def per_row(v):
        vp = jnp.pad(v.astype(jnp.float32), (0, C_pad - C))
        return jnp.tile(vp, N).reshape(NCp, 1)

    w1m = blockdiag(w1)
    w2m = blockdiag(w2)

    # VMEM limit derived from the actual footprint (im2col staging counted in both
    # f32 and bf16 form) with generous headroom, clamped to v7x's 64 MiB budget.
    col_bytes = 9 * NCp * HW * (4 + 2)
    io_bytes = 2 * NCp * HW * 4
    w_bytes = 2 * NCp * 9 * NCp * 2
    vmem_limit = int(min(64 * 1024 * 1024,
                         max(4 * 1024 * 1024,
                             8 * (col_bytes + io_bytes + w_bytes))))

    flops = 2 * (2 * NCp * (9 * NCp) * HW) + 12 * NCp * HW
    bytes_accessed = io_bytes + w_bytes + 4 * NCp * 4 + 4
    cost = pl.CostEstimate(flops=flops, transcendentals=2 * C_pad,
                           bytes_accessed=bytes_accessed)

    vmem = pl.BlockSpec(memory_space=pltpu.MemorySpace.VMEM)
    smem = pl.BlockSpec(memory_space=pltpu.MemorySpace.SMEM)

    out2d = pl.pallas_call(
        functools.partial(residual_block_kernel, N=N, C_pad=C_pad, H=H, W=W),
        out_shape=jax.ShapeDtypeStruct((NCp, HW), jnp.float32),
        in_specs=[vmem, vmem, vmem, vmem, vmem, vmem, vmem, smem],
        out_specs=vmem,
        compiler_params=pltpu.CompilerParams(vmem_limit_bytes=vmem_limit),
        cost_estimate=cost,
    )(x2d, w1m, w2m,
      per_row(g1), per_row(be1), per_row(g2), per_row(be2),
      a.reshape(1))

    out = out2d.reshape(N, C_pad, H, W)[:, :C, :, :]   # free reshape + pad slice
    return out.astype(x_nchw.dtype)


def reference_nchw(x_nchw, params):
    """Pure-JAX reference (full f32 math, with conv bias) for correctness checks."""
    w1, b1, g1, be1, w2, b2, g2, be2, a = params
    x = jnp.transpose(x_nchw, (0, 2, 3, 1)).astype(jnp.float32)   # NHWC
    C = x.shape[-1]

    def conv(y, w, b):
        # w: (C_out, 9, C_in) tap-major  ->  HWIO (3, 3, C_in, C_out)
        w_hwio = jnp.transpose(w, (1, 2, 0)).reshape(3, 3, C, C)
        out = lax.conv_general_dilated(
            y, w_hwio, window_strides=(1, 1), padding="SAME",
            dimension_numbers=("NHWC", "HWIO", "NHWC"))
        return out + b.reshape(1, 1, 1, C)

    def bn(y, g, be):
        mean = jnp.mean(y, axis=(0, 1, 2), keepdims=True)
        var = jnp.mean((y - mean) ** 2, axis=(0, 1, 2), keepdims=True)
        return (y - mean) / jnp.sqrt(var + EPS) * g.reshape(1, 1, 1, C) \
            + be.reshape(1, 1, 1, C)

    h = bn(conv(x, w1, b1), g1, be1)
    h = jnp.where(h > 0, h, h * a.reshape(()))
    h = bn(conv(h, w2, b2), g2, be2)
    return jnp.transpose(x + h, (0, 3, 1, 2))


def init_params(key, c):
    k1, k2, k3, k4 = jax.random.split(key, 4)
    bound = 1.0 / (c * 9) ** 0.5                     # PyTorch-style fan-in bound
    w1 = jax.random.uniform(k1, (c, 9, c), jnp.float32, -bound, bound)
    b1 = jax.random.uniform(k2, (c,), jnp.float32, -bound, bound)
    w2 = jax.random.uniform(k3, (c, 9, c), jnp.float32, -bound, bound)
    b2 = jax.random.uniform(k4, (c,), jnp.float32, -bound, bound)
    g1 = jnp.ones((c,), jnp.float32)                 # BN defaults
    be1 = jnp.zeros((c,), jnp.float32)
    g2 = jnp.ones((c,), jnp.float32)
    be2 = jnp.zeros((c,), jnp.float32)
    a = jnp.full((1,), 0.25, jnp.float32)            # PReLU default slope
    return (w1, b1, g1, be1, w2, b2, g2, be2, a)


if __name__ == "__main__":
    key = jax.random.PRNGKey(0)
    k_x, k_p = jax.random.split(key)

    N, C, H, W = 2, 4, 16, 16
    x = jax.random.normal(k_x, (N, C, H, W), jnp.float32)   # NCHW like PyTorch
    params = init_params(k_p, C)

    out = jax.block_until_ready(residual_block_nchw(x, params))
    ref = reference_nchw(x, params)

    assert out.shape == (N, C, H, W)
    max_diff = float(jnp.max(jnp.abs(out - ref)))
    # Tolerance is loosened vs. an all-f32 implementation because the conv matmuls
    # use bf16 MXU operands (f32 accumulation); values are O(1), BN renormalizes, and
    # the skip path stays f32, so errors are ~1e-2 level.  A real bug (wrong shift /
    # mask / block-diagonal weight layout) would be orders of magnitude larger.
    assert jnp.allclose(out, ref, atol=5e-2, rtol=5e-2), f"max abs diff {max_diff}"

    print("KERNEL_OK")
</pallas_src>

<mosaic_0001>
module attributes {stable_mosaic.version = 11 : i64} {
  func.func @residual_block_kernel(%arg0: memref<8x256xf32, #tpu.memory_space<vmem>>, %arg1: memref<8x72xbf16, #tpu.memory_space<vmem>>, %arg2: memref<8x72xbf16, #tpu.memory_space<vmem>>, %arg3: memref<8x1xf32, #tpu.memory_space<vmem>>, %arg4: memref<8x1xf32, #tpu.memory_space<vmem>>, %arg5: memref<8x1xf32, #tpu.memory_space<vmem>>, %arg6: memref<8x1xf32, #tpu.memory_space<vmem>>, %arg7: memref<1xf32, #tpu.memory_space<smem>>, %arg8: memref<8x256xf32, #tpu.memory_space<vmem>>) attributes {dimension_semantics = [], scalar_prefetch = 0 : i64, scratch_operands = 0 : i64, tpu.core_type = #tpu.core_type<tc>} {
    %0 = tpu.iota {dimensions = array<i32: 1>} : vector<1x256xi32>
    %c15_i32 = arith.constant 15 : i32
    %1 = vector.broadcast %c15_i32 : i32 to vector<1x256xi32>
    %2 = arith.andi %0, %1 : vector<1x256xi32>
    %c4_i32 = arith.constant 4 : i32
    %3 = vector.broadcast %c4_i32 : i32 to vector<1x256xi32>
    %4 = arith.shrsi %0, %3 : vector<1x256xi32>
    %c-1_i32 = arith.constant -1 : i32
    %5 = vector.broadcast %c-1_i32 : i32 to vector<1x256xi32>
    %6 = arith.addi %4, %5 : vector<1x256xi32>
    %c-1_i32_0 = arith.constant -1 : i32
    %7 = vector.broadcast %c-1_i32_0 : i32 to vector<1x256xi32>
    %8 = arith.addi %2, %7 : vector<1x256xi32>
    %c0_i32 = arith.constant 0 : i32
    %9 = vector.broadcast %c0_i32 : i32 to vector<1x256xi32>
    %10 = arith.cmpi sge, %6, %9 : vector<1x256xi32>
    %c16_i32 = arith.constant 16 : i32
    %11 = vector.broadcast %c16_i32 : i32 to vector<1x256xi32>
    %12 = arith.cmpi slt, %6, %11 : vector<1x256xi32>
    %13 = arith.andi %10, %12 : vector<1x256xi1>
    %c0_i32_1 = arith.constant 0 : i32
    %14 = vector.broadcast %c0_i32_1 : i32 to vector<1x256xi32>
    %15 = arith.cmpi sge, %8, %14 : vector<1x256xi32>
    %16 = arith.andi %13, %15 : vector<1x256xi1>
    %c16_i32_2 = arith.constant 16 : i32
    %17 = vector.broadcast %c16_i32_2 : i32 to vector<1x256xi32>
    %18 = arith.cmpi slt, %8, %17 : vector<1x256xi32>
    %19 = arith.andi %16, %18 : vector<1x256xi1>
    %c-1_i32_3 = arith.constant -1 : i32
    %20 = vector.broadcast %c-1_i32_3 : i32 to vector<1x256xi32>
    %21 = arith.addi %4, %20 : vector<1x256xi32>
    %c0_i32_4 = arith.constant 0 : i32
    %22 = vector.broadcast %c0_i32_4 : i32 to vector<1x256xi32>
    %23 = arith.addi %2, %22 : vector<1x256xi32>
    %c0_i32_5 = arith.constant 0 : i32
    %24 = vector.broadcast %c0_i32_5 : i32 to vector<1x256xi32>
    %25 = arith.cmpi sge, %21, %24 : vector<1x256xi32>
    %c16_i32_6 = arith.constant 16 : i32
    %26 = vector.broadcast %c16_i32_6 : i32 to vector<1x256xi32>
    %27 = arith.cmpi slt, %21, %26 : vector<1x256xi32>
    %28 = arith.andi %25, %27 : vector<1x256xi1>
    %c0_i32_7 = arith.constant 0 : i32
    %29 = vector.broadcast %c0_i32_7 : i32 to vector<1x256xi32>
    %30 = arith.cmpi sge, %23, %29 : vector<1x256xi32>
    %31 = arith.andi %28, %30 : vector<1x256xi1>
    %c16_i32_8 = arith.constant 16 : i32
    %32 = vector.broadcast %c16_i32_8 : i32 to vector<1x256xi32>
    %33 = arith.cmpi slt, %23, %32 : vector<1x256xi32>
    %34 = arith.andi %31, %33 : vector<1x256xi1>
    %c-1_i32_9 = arith.constant -1 : i32
    %35 = vector.broadcast %c-1_i32_9 : i32 to vector<1x256xi32>
    %36 = arith.addi %4, %35 : vector<1x256xi32>
    %c1_i32 = arith.constant 1 : i32
    %37 = vector.broadcast %c1_i32 : i32 to vector<1x256xi32>
    %38 = arith.addi %2, %37 : vector<1x256xi32>
    %c0_i32_10 = arith.constant 0 : i32
    %39 = vector.broadcast %c0_i32_10 : i32 to vector<1x256xi32>
    %40 = arith.cmpi sge, %36, %39 : vector<1x256xi32>
    %c16_i32_11 = arith.constant 16 : i32
    %41 = vector.broadcast %c16_i32_11 : i32 to vector<1x256xi32>
    %42 = arith.cmpi slt, %36, %41 : vector<1x256xi32>
    %43 = arith.andi %40, %42 : vector<1x256xi1>
    %c0_i32_12 = arith.constant 0 : i32
    %44 = vector.broadcast %c0_i32_12 : i32 to vector<1x256xi32>
    %45 = arith.cmpi sge, %38, %44 : vector<1x256xi32>
    %46 = arith.andi %43, %45 : vector<1x256xi1>
    %c16_i32_13 = arith.constant 16 : i32
    %47 = vector.broadcast %c16_i32_13 : i32 to vector<1x256xi32>
    %48 = arith.cmpi slt, %38, %47 : vector<1x256xi32>
    %49 = arith.andi %46, %48 : vector<1x256xi1>
    %c0_i32_14 = arith.constant 0 : i32
    %50 = vector.broadcast %c0_i32_14 : i32 to vector<1x256xi32>
    %51 = arith.addi %4, %50 : vector<1x256xi32>
    %c-1_i32_15 = arith.constant -1 : i32
    %52 = vector.broadcast %c-1_i32_15 : i32 to vector<1x256xi32>
    %53 = arith.addi %2, %52 : vector<1x256xi32>
    %c0_i32_16 = arith.constant 0 : i32
    %54 = vector.broadcast %c0_i32_16 : i32 to vector<1x256xi32>
    %55 = arith.cmpi sge, %51, %54 : vector<1x256xi32>
    %c16_i32_17 = arith.constant 16 : i32
    %56 = vector.broadcast %c16_i32_17 : i32 to vector<1x256xi32>
    %57 = arith.cmpi slt, %51, %56 : vector<1x256xi32>
    %58 = arith.andi %55, %57 : vector<1x256xi1>
    %c0_i32_18 = arith.constant 0 : i32
    %59 = vector.broadcast %c0_i32_18 : i32 to vector<1x256xi32>
    %60 = arith.cmpi sge, %53, %59 : vector<1x256xi32>
    %61 = arith.andi %58, %60 : vector<1x256xi1>
    %c16_i32_19 = arith.constant 16 : i32
    %62 = vector.broadcast %c16_i32_19 : i32 to vector<1x256xi32>
    %63 = arith.cmpi slt, %53, %62 : vector<1x256xi32>
    %64 = arith.andi %61, %63 : vector<1x256xi1>
    %c0_i32_20 = arith.constant 0 : i32
    %65 = vector.broadcast %c0_i32_20 : i32 to vector<1x256xi32>
    %66 = arith.addi %4, %65 : vector<1x256xi32>
    %c1_i32_21 = arith.constant 1 : i32
    %67 = vector.broadcast %c1_i32_21 : i32 to vector<1x256xi32>
    %68 = arith.addi %2, %67 : vector<1x256xi32>
    %c0_i32_22 = arith.constant 0 : i32
    %69 = vector.broadcast %c0_i32_22 : i32 to vector<1x256xi32>
    %70 = arith.cmpi sge, %66, %69 : vector<1x256xi32>
    %c16_i32_23 = arith.constant 16 : i32
    %71 = vector.broadcast %c16_i32_23 : i32 to vector<1x256xi32>
    %72 = arith.cmpi slt, %66, %71 : vector<1x256xi32>
    %73 = arith.andi %70, %72 : vector<1x256xi1>
    %c0_i32_24 = arith.constant 0 : i32
    %74 = vector.broadcast %c0_i32_24 : i32 to vector<1x256xi32>
    %75 = arith.cmpi sge, %68, %74 : vector<1x256xi32>
    %76 = arith.andi %73, %75 : vector<1x256xi1>
    %c16_i32_25 = arith.constant 16 : i32
    %77 = vector.broadcast %c16_i32_25 : i32 to vector<1x256xi32>
    %78 = arith.cmpi slt, %68, %77 : vector<1x256xi32>
    %79 = arith.andi %76, %78 : vector<1x256xi1>
    %c1_i32_26 = arith.constant 1 : i32
    %80 = vector.broadcast %c1_i32_26 : i32 to vector<1x256xi32>
    %81 = arith.addi %4, %80 : vector<1x256xi32>
    %c-1_i32_27 = arith.constant -1 : i32
    %82 = vector.broadcast %c-1_i32_27 : i32 to vector<1x256xi32>
    %83 = arith.addi %2, %82 : vector<1x256xi32>
    %c0_i32_28 = arith.constant 0 : i32
    %84 = vector.broadcast %c0_i32_28 : i32 to vector<1x256xi32>
    %85 = arith.cmpi sge, %81, %84 : vector<1x256xi32>
    %c16_i32_29 = arith.constant 16 : i32
    %86 = vector.broadcast %c16_i32_29 : i32 to vector<1x256xi32>
    %87 = arith.cmpi slt, %81, %86 : vector<1x256xi32>
    %88 = arith.andi %85, %87 : vector<1x256xi1>
    %c0_i32_30 = arith.constant 0 : i32
    %89 = vector.broadcast %c0_i32_30 : i32 to vector<1x256xi32>
    %90 = arith.cmpi sge, %83, %89 : vector<1x256xi32>
    %91 = arith.andi %88, %90 : vector<1x256xi1>
    %c16_i32_31 = arith.constant 16 : i32
    %92 = vector.broadcast %c16_i32_31 : i32 to vector<1x256xi32>
    %93 = arith.cmpi slt, %83, %92 : vector<1x256xi32>
    %94 = arith.andi %91, %93 : vector<1x256xi1>
    %c1_i32_32 = arith.constant 1 : i32
    %95 = vector.broadcast %c1_i32_32 : i32 to vector<1x256xi32>
    %96 = arith.addi %4, %95 : vector<1x256xi32>
    %c0_i32_33 = arith.constant 0 : i32
    %97 = vector.broadcast %c0_i32_33 : i32 to vector<1x256xi32>
    %98 = arith.addi %2, %97 : vector<1x256xi32>
    %c0_i32_34 = arith.constant 0 : i32
    %99 = vector.broadcast %c0_i32_34 : i32 to vector<1x256xi32>
    %100 = arith.cmpi sge, %96, %99 : vector<1x256xi32>
    %c16_i32_35 = arith.constant 16 : i32
    %101 = vector.broadcast %c16_i32_35 : i32 to vector<1x256xi32>
    %102 = arith.cmpi slt, %96, %101 : vector<1x256xi32>
    %103 = arith.andi %100, %102 : vector<1x256xi1>
    %c0_i32_36 = arith.constant 0 : i32
    %104 = vector.broadcast %c0_i32_36 : i32 to vector<1x256xi32>
    %105 = arith.cmpi sge, %98, %104 : vector<1x256xi32>
    %106 = arith.andi %103, %105 : vector<1x256xi1>
    %c16_i32_37 = arith.constant 16 : i32
    %107 = vector.broadcast %c16_i32_37 : i32 to vector<1x256xi32>
    %108 = arith.cmpi slt, %98, %107 : vector<1x256xi32>
    %109 = arith.andi %106, %108 : vector<1x256xi1>
    %c1_i32_38 = arith.constant 1 : i32
    %110 = vector.broadcast %c1_i32_38 : i32 to vector<1x256xi32>
    %111 = arith.addi %4, %110 : vector<1x256xi32>
    %c1_i32_39 = arith.constant 1 : i32
    %112 = vector.broadcast %c1_i32_39 : i32 to vector<1x256xi32>
    %113 = arith.addi %2, %112 : vector<1x256xi32>
    %c0_i32_40 = arith.constant 0 : i32
    %114 = vector.broadcast %c0_i32_40 : i32 to vector<1x256xi32>
    %115 = arith.cmpi sge, %111, %114 : vector<1x256xi32>
    %c16_i32_41 = arith.constant 16 : i32
    %116 = vector.broadcast %c16_i32_41 : i32 to vector<1x256xi32>
    %117 = arith.cmpi slt, %111, %116 : vector<1x256xi32>
    %118 = arith.andi %115, %117 : vector<1x256xi1>
    %c0_i32_42 = arith.constant 0 : i32
    %119 = vector.broadcast %c0_i32_42 : i32 to vector<1x256xi32>
    %120 = arith.cmpi sge, %113, %119 : vector<1x256xi32>
    %121 = arith.andi %118, %120 : vector<1x256xi1>
    %c16_i32_43 = arith.constant 16 : i32
    %122 = vector.broadcast %c16_i32_43 : i32 to vector<1x256xi32>
    %123 = arith.cmpi slt, %113, %122 : vector<1x256xi32>
    %124 = arith.andi %121, %123 : vector<1x256xi1>
    %c0 = arith.constant 0 : index
    %c0_44 = arith.constant 0 : index
    %125 = vector.load %arg0[%c0, %c0_44] : memref<8x256xf32, #tpu.memory_space<vmem>>, vector<8x256xf32>
    %c0_45 = arith.constant 0 : index
    %126 = memref.load %arg7[%c0_45] : memref<1xf32, #tpu.memory_space<smem>>
    %c17_i32 = arith.constant 17 : i32
    %127 = tpu.dynamic_rotate %125 by %c17_i32 dim 1 : vector<8x256xf32>, i32 -> vector<8x256xf32>
    %cst = arith.constant 0.000000e+00 : f32
    %128 = vector.shape_cast %19 : vector<1x256xi1> to vector<1x256xi1>
    %129 = vector.broadcast %128 : vector<1x256xi1> to vector<8x256xi1>
    %130 = vector.broadcast %cst : f32 to vector<8x256xf32>
    %131 = arith.select %129, %127, %130 : vector<8x256xi1>, vector<8x256xf32>
    %c16_i32_46 = arith.constant 16 : i32
    %132 = tpu.dynamic_rotate %125 by %c16_i32_46 dim 1 : vector<8x256xf32>, i32 -> vector<8x256xf32>
    %cst_47 = arith.constant 0.000000e+00 : f32
    %133 = vector.shape_cast %34 : vector<1x256xi1> to vector<1x256xi1>
    %134 = vector.broadcast %133 : vector<1x256xi1> to vector<8x256xi1>
    %135 = vector.broadcast %cst_47 : f32 to vector<8x256xf32>
    %136 = arith.select %134, %132, %135 : vector<8x256xi1>, vector<8x256xf32>
    %c15_i32_48 = arith.constant 15 : i32
    %137 = tpu.dynamic_rotate %125 by %c15_i32_48 dim 1 : vector<8x256xf32>, i32 -> vector<8x256xf32>
    %cst_49 = arith.constant 0.000000e+00 : f32
    %138 = vector.shape_cast %49 : vector<1x256xi1> to vector<1x256xi1>
    %139 = vector.broadcast %138 : vector<1x256xi1> to vector<8x256xi1>
    %140 = vector.broadcast %cst_49 : f32 to vector<8x256xf32>
    %141 = arith.select %139, %137, %140 : vector<8x256xi1>, vector<8x256xf32>
    %c1_i32_50 = arith.constant 1 : i32
    %142 = tpu.dynamic_rotate %125 by %c1_i32_50 dim 1 : vector<8x256xf32>, i32 -> vector<8x256xf32>
    %cst_51 = arith.constant 0.000000e+00 : f32
    %143 = vector.shape_cast %64 : vector<1x256xi1> to vector<1x256xi1>
    %144 = vector.broadcast %143 : vector<1x256xi1> to vector<8x256xi1>
    %145 = vector.broadcast %cst_51 : f32 to vector<8x256xf32>
    %146 = arith.select %144, %142, %145 : vector<8x256xi1>, vector<8x256xf32>
    %c255_i32 = arith.constant 255 : i32
    %147 = tpu.dynamic_rotate %125 by %c255_i32 dim 1 : vector<8x256xf32>, i32 -> vector<8x256xf32>
    %cst_52 = arith.constant 0.000000e+00 : f32
    %148 = vector.shape_cast %79 : vector<1x256xi1> to vector<1x256xi1>
    %149 = vector.broadcast %148 : vector<1x256xi1> to vector<8x256xi1>
    %150 = vector.broadcast %cst_52 : f32 to vector<8x256xf32>
    %151 = arith.select %149, %147, %150 : vector<8x256xi1>, vector<8x256xf32>
    %c241_i32 = arith.constant 241 : i32
    %152 = tpu.dynamic_rotate %125 by %c241_i32 dim 1 : vector<8x256xf32>, i32 -> vector<8x256xf32>
    %cst_53 = arith.constant 0.000000e+00 : f32
    %153 = vector.shape_cast %94 : vector<1x256xi1> to vector<1x256xi1>
    %154 = vector.broadcast %153 : vector<1x256xi1> to vector<8x256xi1>
    %155 = vector.broadcast %cst_53 : f32 to vector<8x256xf32>
    %156 = arith.select %154, %152, %155 : vector<8x256xi1>, vector<8x256xf32>
    %c240_i32 = arith.constant 240 : i32
    %157 = tpu.dynamic_rotate %125 by %c240_i32 dim 1 : vector<8x256xf32>, i32 -> vector<8x256xf32>
    %cst_54 = arith.constant 0.000000e+00 : f32
    %158 = vector.shape_cast %109 : vector<1x256xi1> to vector<1x256xi1>
    %159 = vector.broadcast %158 : vector<1x256xi1> to vector<8x256xi1>
    %160 = vector.broadcast %cst_54 : f32 to vector<8x256xf32>
    %161 = arith.select %159, %157, %160 : vector<8x256xi1>, vector<8x256xf32>
    %c239_i32 = arith.constant 239 : i32
    %162 = tpu.dynamic_rotate %125 by %c239_i32 dim 1 : vector<8x256xf32>, i32 -> vector<8x256xf32>
    %cst_55 = arith.constant 0.000000e+00 : f32
    %163 = vector.shape_cast %124 : vector<1x256xi1> to vector<1x256xi1>
    %164 = vector.broadcast %163 : vector<1x256xi1> to vector<8x256xi1>
    %165 = vector.broadcast %cst_55 : f32 to vector<8x256xf32>
    %166 = arith.select %164, %162, %165 : vector<8x256xi1>, vector<8x256xf32>
    %167 = tpu.concatenate %131, %136, %141, %146, %125, %151, %156, %161, %166 in 0 : vector<8x256xf32>, vector<8x256xf32>, vector<8x256xf32>, vector<8x256xf32>, vector<8x256xf32>, vector<8x256xf32>, vector<8x256xf32>, vector<8x256xf32>, vector<8x256xf32> -> vector<72x256xf32>
    %168 = arith.truncf %167 : vector<72x256xf32> to vector<72x256xbf16>
    %c0_56 = arith.constant 0 : index
    %c0_57 = arith.constant 0 : index
    %169 = vector.load %arg1[%c0_56, %c0_57] : memref<8x72xbf16, #tpu.memory_space<vmem>>, vector<8x72xbf16>
    %cst_58 = arith.constant dense<0.000000e+00> : vector<8x256xf32>
    %170 = tpu.matmul %169, %168, %cst_58 {dimension_numbers = #tpu.dot_dimension_numbers<[1], [0], [0], [1], [0, 0, 1, 1], [], []>} : vector<8x72xbf16>, vector<72x256xbf16>, vector<8x256xf32> -> vector<8x256xf32>
    %cst_59 = arith.constant dense<0.000000e+00> : vector<8xf32>
    %171 = vector.multi_reduction <add>, %170, %cst_59 [1] : vector<8x256xf32> to vector<8xf32>
    %172 = vector.shape_cast %171 : vector<8xf32> to vector<8x1xf32>
    %173 = arith.mulf %170, %170 : vector<8x256xf32>
    %cst_60 = arith.constant dense<0.000000e+00> : vector<8xf32>
    %174 = vector.multi_reduction <add>, %173, %cst_60 [1] : vector<8x256xf32> to vector<8xf32>
    %175 = vector.shape_cast %174 : vector<8xf32> to vector<8x1xf32>
    %176 = vector.extract_strided_slice %172 {offsets = [0, 0], sizes = [4, 1], strides = [1, 1]} : vector<8x1xf32> to vector<4x1xf32>
    %177 = vector.extract_strided_slice %175 {offsets = [0, 0], sizes = [4, 1], strides = [1, 1]} : vector<8x1xf32> to vector<4x1xf32>
    %178 = vector.extract_strided_slice %172 {offsets = [4, 0], sizes = [4, 1], strides = [1, 1]} : vector<8x1xf32> to vector<4x1xf32>
    %179 = arith.addf %176, %178 : vector<4x1xf32>
    %180 = vector.extract_strided_slice %175 {offsets = [4, 0], sizes = [4, 1], strides = [1, 1]} : vector<8x1xf32> to vector<4x1xf32>
    %181 = arith.addf %177, %180 : vector<4x1xf32>
    %cst_61 = arith.constant 0.001953125 : f32
    %182 = vector.broadcast %cst_61 : f32 to vector<4x1xf32>
    %183 = arith.mulf %179, %182 : vector<4x1xf32>
    %cst_62 = arith.constant 0.001953125 : f32
    %184 = vector.broadcast %cst_62 : f32 to vector<4x1xf32>
    %185 = arith.mulf %181, %184 : vector<4x1xf32>
    %186 = arith.mulf %183, %183 : vector<4x1xf32>
    %187 = arith.subf %185, %186 : vector<4x1xf32>
    %cst_63 = arith.constant 0.000000e+00 : f32
    %188 = vector.broadcast %cst_63 : f32 to vector<4x1xf32>
    %189 = arith.maximumf %187, %188 : vector<4x1xf32>
    %cst_64 = arith.constant 9.99999974E-6 : f32
    %190 = vector.broadcast %cst_64 : f32 to vector<4x1xf32>
    %191 = arith.addf %189, %190 : vector<4x1xf32>
    %192 = math.rsqrt %191 : vector<4x1xf32>
    %193 = tpu.concatenate %183, %183 in 0 : vector<4x1xf32>, vector<4x1xf32> -> vector<8x1xf32>
    %194 = tpu.concatenate %192, %192 in 0 : vector<4x1xf32>, vector<4x1xf32> -> vector<8x1xf32>
    %c0_65 = arith.constant 0 : index
    %c0_66 = arith.constant 0 : index
    %195 = vector.load %arg3[%c0_65, %c0_66] : memref<8x1xf32, #tpu.memory_space<vmem>>, vector<8x1xf32>
    %196 = arith.mulf %195, %194 : vector<8x1xf32>
    %c0_67 = arith.constant 0 : index
    %c0_68 = arith.constant 0 : index
    %197 = vector.load %arg4[%c0_67, %c0_68] : memref<8x1xf32, #tpu.memory_space<vmem>>, vector<8x1xf32>
    %198 = arith.mulf %193, %196 : vector<8x1xf32>
    %199 = arith.subf %197, %198 : vector<8x1xf32>
    %200 = vector.broadcast %196 : vector<8x1xf32> to vector<8x256xf32>
    %201 = arith.mulf %170, %200 : vector<8x256xf32>
    %202 = vector.broadcast %199 : vector<8x1xf32> to vector<8x256xf32>
    %203 = arith.addf %201, %202 : vector<8x256xf32>
    %cst_69 = arith.constant 0.000000e+00 : f32
    %204 = vector.broadcast %cst_69 : f32 to vector<8x256xf32>
    %205 = arith.cmpf ogt, %203, %204 : vector<8x256xf32>
    %206 = vector.broadcast %126 : f32 to vector<8x256xf32>
    %207 = arith.mulf %203, %206 : vector<8x256xf32>
    %208 = arith.select %205, %203, %207 : vector<8x256xi1>, vector<8x256xf32>
    %c17_i32_70 = arith.constant 17 : i32
    %209 = tpu.dynamic_rotate %208 by %c17_i32_70 dim 1 : vector<8x256xf32>, i32 -> vector<8x256xf32>
    %cst_71 = arith.constant 0.000000e+00 : f32
    %210 = vector.shape_cast %19 : vector<1x256xi1> to vector<1x256xi1>
    %211 = vector.broadcast %210 : vector<1x256xi1> to vector<8x256xi1>
    %212 = vector.broadcast %cst_71 : f32 to vector<8x256xf32>
    %213 = arith.select %211, %209, %212 : vector<8x256xi1>, vector<8x256xf32>
    %c16_i32_72 = arith.constant 16 : i32
    %214 = tpu.dynamic_rotate %208 by %c16_i32_72 dim 1 : vector<8x256xf32>, i32 -> vector<8x256xf32>
    %cst_73 = arith.constant 0.000000e+00 : f32
    %215 = vector.shape_cast %34 : vector<1x256xi1> to vector<1x256xi1>
    %216 = vector.broadcast %215 : vector<1x256xi1> to vector<8x256xi1>
    %217 = vector.broadcast %cst_73 : f32 to vector<8x256xf32>
    %218 = arith.select %216, %214, %217 : vector<8x256xi1>, vector<8x256xf32>
    %c15_i32_74 = arith.constant 15 : i32
    %219 = tpu.dynamic_rotate %208 by %c15_i32_74 dim 1 : vector<8x256xf32>, i32 -> vector<8x256xf32>
    %cst_75 = arith.constant 0.000000e+00 : f32
    %220 = vector.shape_cast %49 : vector<1x256xi1> to vector<1x256xi1>
    %221 = vector.broadcast %220 : vector<1x256xi1> to vector<8x256xi1>
    %222 = vector.broadcast %cst_75 : f32 to vector<8x256xf32>
    %223 = arith.select %221, %219, %222 : vector<8x256xi1>, vector<8x256xf32>
    %c1_i32_76 = arith.constant 1 : i32
    %224 = tpu.dynamic_rotate %208 by %c1_i32_76 dim 1 : vector<8x256xf32>, i32 -> vector<8x256xf32>
    %cst_77 = arith.constant 0.000000e+00 : f32
    %225 = vector.shape_cast %64 : vector<1x256xi1> to vector<1x256xi1>
    %226 = vector.broadcast %225 : vector<1x256xi1> to vector<8x256xi1>
    %227 = vector.broadcast %cst_77 : f32 to vector<8x256xf32>
    %228 = arith.select %226, %224, %227 : vector<8x256xi1>, vector<8x256xf32>
    %c255_i32_78 = arith.constant 255 : i32
    %229 = tpu.dynamic_rotate %208 by %c255_i32_78 dim 1 : vector<8x256xf32>, i32 -> vector<8x256xf32>
    %cst_79 = arith.constant 0.000000e+00 : f32
    %230 = vector.shape_cast %79 : vector<1x256xi1> to vector<1x256xi1>
    %231 = vector.broadcast %230 : vector<1x256xi1> to vector<8x256xi1>
    %232 = vector.broadcast %cst_79 : f32 to vector<8x256xf32>
    %233 = arith.select %231, %229, %232 : vector<8x256xi1>, vector<8x256xf32>
    %c241_i32_80 = arith.constant 241 : i32
    %234 = tpu.dynamic_rotate %208 by %c241_i32_80 dim 1 : vector<8x256xf32>, i32 -> vector<8x256xf32>
    %cst_81 = arith.constant 0.000000e+00 : f32
    %235 = vector.shape_cast %94 : vector<1x256xi1> to vector<1x256xi1>
    %236 = vector.broadcast %235 : vector<1x256xi1> to vector<8x256xi1>
    %237 = vector.broadcast %cst_81 : f32 to vector<8x256xf32>
    %238 = arith.select %236, %234, %237 : vector<8x256xi1>, vector<8x256xf32>
    %c240_i32_82 = arith.constant 240 : i32
    %239 = tpu.dynamic_rotate %208 by %c240_i32_82 dim 1 : vector<8x256xf32>, i32 -> vector<8x256xf32>
    %cst_83 = arith.constant 0.000000e+00 : f32
    %240 = vector.shape_cast %109 : vector<1x256xi1> to vector<1x256xi1>
    %241 = vector.broadcast %240 : vector<1x256xi1> to vector<8x256xi1>
    %242 = vector.broadcast %cst_83 : f32 to vector<8x256xf32>
    %243 = arith.select %241, %239, %242 : vector<8x256xi1>, vector<8x256xf32>
    %c239_i32_84 = arith.constant 239 : i32
    %244 = tpu.dynamic_rotate %208 by %c239_i32_84 dim 1 : vector<8x256xf32>, i32 -> vector<8x256xf32>
    %cst_85 = arith.constant 0.000000e+00 : f32
    %245 = vector.shape_cast %124 : vector<1x256xi1> to vector<1x256xi1>
    %246 = vector.broadcast %245 : vector<1x256xi1> to vector<8x256xi1>
    %247 = vector.broadcast %cst_85 : f32 to vector<8x256xf32>
    %248 = arith.select %246, %244, %247 : vector<8x256xi1>, vector<8x256xf32>
    %249 = tpu.concatenate %213, %218, %223, %228, %208, %233, %238, %243, %248 in 0 : vector<8x256xf32>, vector<8x256xf32>, vector<8x256xf32>, vector<8x256xf32>, vector<8x256xf32>, vector<8x256xf32>, vector<8x256xf32>, vector<8x256xf32>, vector<8x256xf32> -> vector<72x256xf32>
    %250 = arith.truncf %249 : vector<72x256xf32> to vector<72x256xbf16>
    %c0_86 = arith.constant 0 : index
    %c0_87 = arith.constant 0 : index
    %251 = vector.load %arg2[%c0_86, %c0_87] : memref<8x72xbf16, #tpu.memory_space<vmem>>, vector<8x72xbf16>
    %cst_88 = arith.constant dense<0.000000e+00> : vector<8x256xf32>
    %252 = tpu.matmul %251, %250, %cst_88 {dimension_numbers = #tpu.dot_dimension_numbers<[1], [0], [0], [1], [0, 0, 1, 1], [], []>} : vector<8x72xbf16>, vector<72x256xbf16>, vector<8x256xf32> -> vector<8x256xf32>
    %cst_89 = arith.constant dense<0.000000e+00> : vector<8xf32>
    %253 = vector.multi_reduction <add>, %252, %cst_89 [1] : vector<8x256xf32> to vector<8xf32>
    %254 = vector.shape_cast %253 : vector<8xf32> to vector<8x1xf32>
    %255 = arith.mulf %252, %252 : vector<8x256xf32>
    %cst_90 = arith.constant dense<0.000000e+00> : vector<8xf32>
    %256 = vector.multi_reduction <add>, %255, %cst_90 [1] : vector<8x256xf32> to vector<8xf32>
    %257 = vector.shape_cast %256 : vector<8xf32> to vector<8x1xf32>
    %258 = vector.extract_strided_slice %254 {offsets = [0, 0], sizes = [4, 1], strides = [1, 1]} : vector<8x1xf32> to vector<4x1xf32>
    %259 = vector.extract_strided_slice %257 {offsets = [0, 0], sizes = [4, 1], strides = [1, 1]} : vector<8x1xf32> to vector<4x1xf32>
    %260 = vector.extract_strided_slice %254 {offsets = [4, 0], sizes = [4, 1], strides = [1, 1]} : vector<8x1xf32> to vector<4x1xf32>
    %261 = arith.addf %258, %260 : vector<4x1xf32>
    %262 = vector.extract_strided_slice %257 {offsets = [4, 0], sizes = [4, 1], strides = [1, 1]} : vector<8x1xf32> to vector<4x1xf32>
    %263 = arith.addf %259, %262 : vector<4x1xf32>
    %cst_91 = arith.constant 0.001953125 : f32
    %264 = vector.broadcast %cst_91 : f32 to vector<4x1xf32>
    %265 = arith.mulf %261, %264 : vector<4x1xf32>
    %cst_92 = arith.constant 0.001953125 : f32
    %266 = vector.broadcast %cst_92 : f32 to vector<4x1xf32>
    %267 = arith.mulf %263, %266 : vector<4x1xf32>
    %268 = arith.mulf %265, %265 : vector<4x1xf32>
    %269 = arith.subf %267, %268 : vector<4x1xf32>
    %cst_93 = arith.constant 0.000000e+00 : f32
    %270 = vector.broadcast %cst_93 : f32 to vector<4x1xf32>
    %271 = arith.maximumf %269, %270 : vector<4x1xf32>
    %cst_94 = arith.constant 9.99999974E-6 : f32
    %272 = vector.broadcast %cst_94 : f32 to vector<4x1xf32>
    %273 = arith.addf %271, %272 : vector<4x1xf32>
    %274 = math.rsqrt %273 : vector<4x1xf32>
    %275 = tpu.concatenate %265, %265 in 0 : vector<4x1xf32>, vector<4x1xf32> -> vector<8x1xf32>
    %276 = tpu.concatenate %274, %274 in 0 : vector<4x1xf32>, vector<4x1xf32> -> vector<8x1xf32>
    %c0_95 = arith.constant 0 : index
    %c0_96 = arith.constant 0 : index
    %277 = vector.load %arg5[%c0_95, %c0_96] : memref<8x1xf32, #tpu.memory_space<vmem>>, vector<8x1xf32>
    %278 = arith.mulf %277, %276 : vector<8x1xf32>
    %c0_97 = arith.constant 0 : index
    %c0_98 = arith.constant 0 : index
    %279 = vector.load %arg6[%c0_97, %c0_98] : memref<8x1xf32, #tpu.memory_space<vmem>>, vector<8x1xf32>
    %280 = arith.mulf %275, %278 : vector<8x1xf32>
    %281 = arith.subf %279, %280 : vector<8x1xf32>
    %282 = vector.broadcast %278 : vector<8x1xf32> to vector<8x256xf32>
    %283 = arith.mulf %252, %282 : vector<8x256xf32>
    %284 = vector.broadcast %281 : vector<8x1xf32> to vector<8x256xf32>
    %285 = arith.addf %283, %284 : vector<8x256xf32>
    %286 = arith.addf %125, %285 : vector<8x256xf32>
    %c0_99 = arith.constant 0 : index
    %c0_100 = arith.constant 0 : index
    %287 = vector.load %arg8[%c0_99, %c0_100] : memref<8x256xf32, #tpu.memory_space<vmem>>, vector<8x256xf32>
    tpu.vector_store %arg8[%c0_99, %c0_100], %286 {strides = array<i32>} : memref<8x256xf32, #tpu.memory_space<vmem>>, vector<8x256xf32>,
    return
  }
}

</mosaic_0001>

<bundles_post_ra>
// kernel: tile.23
= control target key start
LH: loop header
LB: loop body
LE: loop exit
PB: predicated region body
PF: predicated region fallthrough
CT: control target
= control target key end

     0   :  { %s22_s0 = inlined_call_operand.vmem [shape: f32[4], index: 0, kind: input, shape index: {}]   ;;  %s23_s1 = inlined_call_operand.vmem [shape: f32[2,4], index: 1, kind: output, shape index: {}]  }
   0x1   :  { %v4_v0 = vld [vmem:[%s22_s0] ss:$0 sm:$0xff] }
   0x2   :  { %5 = vst [vmem:[%s23_s1] sm:$0x3] %v4_v0 }

// kernel: tile.0
= control target key start
LH: loop header
LB: loop body
LE: loop exit
PB: predicated region body
PF: predicated region fallthrough
CT: control target
= control target key end

     0   :  { %s34_s8 = smov 125   ;;  %s35_s9 = smov 126   ;;  %vm7_vm0 = vcmask 7168   ;;  %s61_s0 = inlined_call_operand.vmem [shape: f32[2,4], index: 0, kind: input, shape index: {}]   ;;  %s62_s1 = inlined_call_operand.vmem [shape: f32[8,1], index: 1, kind: output, shape index: {}]  }
   0x1   :  { %v4_v0 = vld [vmem:[%s61_s0] sm:$0x3]  ;;  %s33_s0 = smov 127  }
   0x2   :  { %5 = vst [vmem:[#allocation0] sm:$0x3] %v4_v0 }
   0x9   :  { %v9_v1 = vld [vmem:[#allocation0] sm:$0x3]  }
   0xa   :  { %v21_v2 = vld [vmem:[#allocation0] sm:$0x3]   ;;  %10 = vrot.lane.b32.xlu0 %v9_v1, %s33_s0 }
   0xb   :  { %22 = vrot.lane.b32.xlu1 %v21_v2, %s34_s8  ;;  %v15_v3 = vld [vmem:[#allocation0] sm:$0x3]  }
   0xc   :  { %v6_v4 = vld [vmem:[#allocation0] sm:$0x3]  }
   0xd   :  { %8 = vst.msk [vmem:[%s62_s1] ss:$4 sm:$0x3] %vm7_vm0, %v6_v4  }
  0x12   :  { %16 = vrot.lane.b32.xlu0 %v15_v3, %s35_s9 }
  0x7c   :  { %v11_v5 = vpop.permute.xlu0 %10  }
  0x7d   :  { %v23_v6 = vpop.permute.xlu1 %22   ;;  %27 = vst.msk [vmem:[%s62_s1 + $0x1] ss:$4 sm:$0x3] %vm7_vm0, %v11_v5  }
  0x7e   :  { %29 = vst.msk [vmem:[%s62_s1 + $0x3] ss:$4 sm:$0x3] %vm7_vm0, %v23_v6  }
  0x84   :  { %v17_v7 = vpop.permute.xlu0 %16  }
  0x85   :  { %28 = vst.msk [vmem:[%s62_s1 + $0x2] ss:$4 sm:$0x3] %vm7_vm0, %v17_v7  }

// kernel: residual_block_nchw.1
= control target key start
LH: loop header
LB: loop body
LE: loop exit
PB: predicated region body
PF: predicated region fallthrough
CT: control target
= control target key end

     0   :  { %s654_s9 = smov 111   ;;  %s655_s10 = smov 112   ;;  %v31_v3 = vlaneseq  ;;  %v1142_v19 = vmov 0  ;;  %v1146_v25 = vmov 0  ;;  %v1150_v30 = vmov 0  ;;  %s1109_s0 = inlined_call_operand.vmem [shape: f32[8,256], index: 0, kind: input, shape index: {}]   ;;  %s1110_s1 = inlined_call_operand.vmem [shape: bf16[8,72], index: 1, kind: input, shape index: {}]   ;;  %s1111_s3 = inlined_call_operand.vmem [shape: f32[8,1], index: 3, kind: input, shape index: {}]   ;;  %s1112_s4 = inlined_call_operand.vmem [shape: f32[8,1], index: 4, kind: input, shape index: {}]   ;;  %s1113_s7 = inlined_call_operand.<no memory space> [shape: f32[1], index: 7, kind: input, shape index: {}]   ;;  %s1114_s2 = inlined_call_operand.vmem [shape: bf16[8,72], index: 2, kind: input, shape index: {}]   ;;  %s1115_s5 = inlined_call_operand.vmem [shape: f32[8,1], index: 5, kind: input, shape index: {}]   ;;  %s1116_s6 = inlined_call_operand.vmem [shape: f32[8,1], index: 6, kind: input, shape index: {}]   ;;  %s1117_s8 = inlined_call_operand.vmem [shape: f32[8,256], index: 8, kind: output, shape index: {}]  }
   0x1   :  { %v712_v0 = vld [vmem:[%s1109_s0] sm:$0xff]  ;;  %v717_v1 = vld [vmem:[%s1109_s0 + $0x8] sm:$0xff]  ;;  %s656_s11 = smov 15   ;;  %s657_s12 = smov 113   ;;  %v1152_v33 = vmov 0  ;;  %v1158_v46 = vmov 0 }
   0x2   :  { %v568_v2 = vpack.i.bf16 %v717_v1, %v712_v0  ;;  %s658_s13 = smov 127   ;;  %s659_s0 = smov 1   ;;  %v729_v4 = vand.u32 127, %v31_v3  ;;  %v1164_v56 = vmov 0  ;;  %v1172_v61 = vmov 0 }
   0x3   :  { %s660_s14 = smov 16   ;;  %s661_s15 = smov 17   ;;  %v225_v37 = vld [vmem:[%s1110_s1] sm:$0xf] }
   0x4   :  { %569 = vrot.lane.b32.xlu0 %v568_v2, %s654_s9  ;;  %579 = vrot.lane.b32.xlu1 %v568_v2, %s655_s10  ;;  %v33_v5 = vadd.s32 128, %v729_v4  ;;  %v36_v6 = vshra.s32 %v729_v4, 4  ;;  %v34_v8 = vand.u32 15, %v729_v4  ;;  %vm1118_vm12 = vcmp.lt.s32.totalorder %v729_v4, 111 }
   0x5   :  { %589 = vrot.lane.b32.xlu2 %v568_v2, %s656_s11 }
   0x6   :  { %v37_v7 = vshra.s32 %v33_v5, 4  ;;  %v88_v9 = vadd.s32 1, %v36_v6  ;;  %v35_v10 = vand.u32 15, %v33_v5  ;;  %v734_v12 = vadd.s32 1, %v34_v8 }
   0x7   :  { %v736_v13 = vadd.s32 4294967295, %v34_v8  ;;  %vm74_vm10 = vcmp.ge.s32.totalorder %v36_v6, 0  ;;  %vm76_vm11 = vcmp.lt.s32.totalorder %v36_v6, 16  ;;  %v38_v27 = vadd.s32 4294967295, %v36_v6 }
   0x8   :  { %v89_v11 = vadd.s32 1, %v37_v7  ;;  %vm90_vm0 = vcmp.ge.s32.totalorder %v88_v9, 0  ;;  %vm92_vm1 = vcmp.lt.s32.totalorder %v88_v9, 16  ;;  %v738_v14 = vadd.s32 1, %v35_v10 }
   0x9   :  { %vm1121_vm4 = vcmp.lt.s32.totalorder %v734_v12, 16  ;;  %vm741_vm5 = vmand %vm90_vm0, %vm92_vm1  ;;  %v745_v16 = vadd.s32 4294967295, %v35_v10  ;;  %vm1120_vm6 = vcmp.ge.s32.totalorder %v736_v13, 0  ;;  %vm75_vm0 = vcmp.ge.s32.totalorder %v37_v7, 0 }
   0xa   :  { %vm91_vm2 = vcmp.ge.s32.totalorder %v89_v11, 0  ;;  %vm93_vm3 = vcmp.lt.s32.totalorder %v89_v11, 16  ;;  %vm1124_vm7 = vcmp.lt.s32.totalorder %v738_v14, 16  ;;  %vm759_vm9 = vmand %vm741_vm5, %vm1121_vm4  ;;  %vm77_vm1 = vcmp.lt.s32.totalorder %v37_v7, 16 }
   0xb   :  { %vm749_vm8 = vmand %vm91_vm2, %vm93_vm3  ;;  %v1143_v19 = vsel %vm759_vm9, 4294967295, %v1142_v19  ;;  %vm1119_vm14 = vcmp.ge.s32.totalorder %v745_v16, 0  ;;  %v39_v34 = vadd.s32 4294967295, %v37_v7  ;;  %vm44_vm3 = vcmp.lt.s32.totalorder %v38_v27, 16 }
   0xc   :  { %574 = vrot.lane.b32.xlu0 %v568_v2, %s657_s12  ;;  %584 = vrot.lane.b32.xlu1 %v568_v2, %s658_s13  ;;  %vm768_vm13 = vmand %vm741_vm5, %vm1120_vm6 }
   0xd   :  { %594 = vrot.lane.b32.xlu2 %v568_v2, %s659_s0  ;;  %vm777_vm15 = vmand %vm749_vm8, %vm1124_vm7 }
   0xe   :  { %v1147_v25 = vsel %vm777_vm15, 4294967295, %v1146_v25  ;;  %vm781_vm2 = vmand %vm74_vm10, %vm76_vm11  ;;  %vm1123_vm11 = vcmask 1043456  }
   0xf   :  { %vm797_vm10 = vmand %vm749_vm8, %vm1119_vm14 }
  0x10   :  { %v1151_v30 = vsel %vm797_vm10, 4294967295, %v1150_v30  ;;  %vm813_vm14 = vmand %vm781_vm2, %vm1121_vm4 }
  0x14   :  { %604 = vrot.lane.b32.xlu1 %v568_v2, %s660_s14  ;;  %599 = vrot.lane.b32.xlu0 %v568_v2, %s661_s15 }
  0x5f   :  { %v753_v18 = vpop.permute.xlu2 %589 }
  0x60   :  { %v592_v43 = vunpack.i.h.bf16 %v753_v18  ;;  %v591_v53 = vunpack.i.l.bf16 %v753_v18 }
  0x67   :  { %v595_v47 = vpop.permute.xlu2 %594 }
  0x68   :  { %v597_v62 = vunpack.i.h.bf16 %v595_v47  ;;  %v596_v63 = vunpack.i.l.bf16 %v595_v47  ;;  %v663_v47 = vmov 0  }
  0x69   :  { %608 = vset.pattern.permute.xlu1 %v663_v47  ;;  %649 = vset.pattern.permute.xlu0 %v663_v47 }
  0x76   :  { %v570_v20 = vpop.permute.xlu0 %569  ;;  %v580_v21 = vpop.permute.xlu1 %579 }
  0x77   :  { %v572_v23 = vunpack.i.h.bf16 %v570_v20  ;;  %v571_v24 = vunpack.i.l.bf16 %v570_v20  ;;  %v582_v38 = vunpack.i.h.bf16 %v580_v21  ;;  %v581_v39 = vunpack.i.l.bf16 %v580_v21 }
  0x79   :  { %v207_v28 = vsel %vm1118_vm12, %v571_v24, %v572_v23  ;;  %v208_v29 = vsel %vm1118_vm12, %v572_v23, %v571_v24  ;;  %vm805_vm12 = vmand %vm75_vm0, %vm77_vm1  ;;  %vm42_vm1 = vcmp.ge.s32.totalorder %v38_v27, 0  ;;  %vm662_vm0 = vmmov 1  }
  0x7a   :  { %v213_v31 = vsel %vm759_vm9, %v207_v28, 0.0  ;;  %v214_v32 = vsel %vm777_vm15, %v208_v29, 0.0  ;;  %v1153_v33 = vsel %vm805_vm12, 4294967295, %v1152_v33  ;;  %vm829_vm15 = vmand %vm805_vm12, %vm1124_vm7  ;;  %vm1130_vm7 = vcmp.lt.s32.totalorder %v729_v4, 15 }
  0x7b   :  { %v223_v35 = vpack.c.bf16 %v213_v31, %v213_v31  ;;  %v224_v36 = vpack.c.bf16 %v214_v32, %v214_v32  ;;  %vm837_vm6 = vmpackc.low %vm813_vm14, %vm662_vm0  ;;  %vm1162_vm14 = vcmp.lt.s32.totalorder %v729_v4, 112  ;;  %vm1171_vm12 = vcmp.ge.s32.totalorder %v39_v34, 0 }
  0x7c   :  { %v1159_v46 = vsel %vm837_vm6, 4294967295, %v1158_v46  ;;  %vm843_vm9 = vmand %vm42_vm1, %vm44_vm3  ;;  %v194_v54 = vsel %vm1162_vm14, %v581_v39, %v582_v38  ;;  %vm1166_vm3 = vcmp.lt.s32.totalorder %v729_v4, 113  ;;  %vm1168_vm6 = vcmp.lt.s32.totalorder %v729_v4, 127 }
  0x7d   :  { %v232_v40 = vsel %vm1123_vm11, %v223_v35, 0  ;;  %v235_v41 = vsel %vm1123_vm11, %v224_v36, 0  ;;  %vm1163_vm11 = vmmov %vm1162_vm14  ;;  %v143_v10 = vsel %vm1130_vm7, %v592_v43, %v591_v53  ;;  %v1196_v35 = vmov 0 }
  0x7e   :  { %v575_v44 = vpop.permute.xlu0 %574  ;;  %240 = vmatpush.bf16.msra.mxu0 %v232_v40  ;;  %253 = vmatpush.bf16.msra.mxu1 %v235_v41  ;;  %v585_v45 = vpop.permute.xlu1 %584  ;;  %v195_v55 = vsel %vm1163_vm11, %v582_v38, %v581_v39  ;;  %vm854_vm4 = vmpackc.low %vm829_vm15, %vm662_vm0  ;;  %vm1170_vm11 = vcmp.lt.s32.totalorder %v39_v34, 16  ;;  %vm1174_vm0 = vcmp.lt.s32.totalorder %v734_v12, 16  ;;  %v142_v12 = vsel %vm1130_vm7, %v591_v53, %v592_v43 }
  0x7f   :  { %v577_v48 = vunpack.i.h.bf16 %v575_v44  ;;  %v576_v49 = vunpack.i.l.bf16 %v575_v44  ;;  %v587_v50 = vunpack.i.h.bf16 %v585_v45  ;;  %v586_v51 = vunpack.i.l.bf16 %v585_v45  ;;  %vm1167_vm1 = vmmov %vm1166_vm3 }
  0x80   :  { %v1165_v56 = vsel %vm854_vm4, 4294967295, %v1164_v56  ;;  %vm1169_vm14 = vmmov %vm1168_vm6  ;;  %vm1190_vm7 = vcmp.ge.s32.totalorder %v736_v13, 0 }
  0x81   :  { %v181_v57 = vsel %vm1166_vm3, %v576_v49, %v577_v48  ;;  %v182_v58 = vsel %vm1167_vm1, %v577_v48, %v576_v49  ;;  %v168_v59 = vsel %vm1168_vm6, %v586_v51, %v587_v50  ;;  %v169_v60 = vsel %vm1169_vm14, %v587_v50, %v586_v51  ;;  %vm869_vm15 = vmand %vm1171_vm12, %vm1170_vm11 }
  0x82   :  { %v1173_v61 = vsel %vm869_vm15, 4294967295, %v1172_v61  ;;  %v507_v2 = vpack.c.bf16 %v194_v54, %v181_v57  ;;  %v520_v3 = vpack.c.bf16 %v195_v55, %v182_v58  ;;  %vm877_vm3 = vmand %vm843_vm9, %vm1174_vm0  ;;  %vm1177_vm6 = vcmp.ge.s32.totalorder %v736_v13, 0 }
  0x83   :  { %vm885_vm12 = vmand %vm781_vm2, %vm1177_vm6  ;;  %vm1129_vm1 = vcmp.lt.s32.totalorder %v729_v4, 1  ;;  %v510_v7 = vpack.c.bf16 %v168_v59, %v712_v0  ;;  %v523_v8 = vpack.c.bf16 %v169_v60, %v717_v1  ;;  %vm1182_vm2 = vcmp.lt.s32.totalorder %v738_v14, 16 }
  0x84   :  { %vm1180_vm14 = vmpackc.low %vm741_vm5, %vm768_vm13  ;;  %vm1185_vm6 = vcmp.ge.s32.totalorder %v745_v16, 0  ;;  %v156_v20 = vsel %vm1129_vm1, %v597_v62, %v596_v63  ;;  %v155_v21 = vsel %vm1129_vm1, %v596_v63, %v597_v62  ;;  %vm1195_vm1 = vcmp.ge.s32.totalorder %v745_v16, 0 }
  0x85   :  { %508 = vmatpush.bf16.msk.msra.mxu0 %vm1180_vm14, %v507_v2  ;;  %vm1181_vm11 = vmpackc.low %vm749_vm8, %vm797_vm10  ;;  %vm1186_vm14 = vnez %v1153_v33  ;;  %v513_v34 = vpack.c.bf16 %v156_v20, %v143_v10  ;;  %v526_v13 = vpack.c.bf16 %v155_v21, %v142_v12 }
  0x86   :  { %521 = vmatpush.bf16.msk.msra.mxu1 %vm1181_vm11, %v520_v3  ;;  %vm906_vm0 = vmand %vm869_vm15, %vm1182_vm2  ;;  %v605_v14 = vpop.permute.xlu1 %604  ;;  %v600_v18 = vpop.permute.xlu0 %599  ;;  %vm1132_vm2 = vcmp.lt.s32.totalorder %v729_v4, 17 }
  0x87   :  { %vm916_vm11 = vmand %vm1186_vm14, %vm1185_vm6  ;;  %v607_v23 = vunpack.i.h.bf16 %v605_v14  ;;  %v606_v24 = vunpack.i.l.bf16 %v605_v14  ;;  %v602_v26 = vunpack.i.h.bf16 %v600_v18  ;;  %v601_v27 = vunpack.i.l.bf16 %v600_v18  ;;  %v303_v18 = vld [vmem:[%s1111_s3] sm:$0xff] }
  0x88   :  { %vm1189_vm14 = vnez %v1159_v46  ;;  %vm944_vm10 = vmand %vm843_vm9, %vm1190_vm7  ;;  %vm1193_vm6 = vcmp.lt.s32.totalorder %v729_v4, 16 }
  0x89   :  { %511 = vmatpush.bf16.msk.msra.mxu0 %vm1189_vm14, %v510_v7  ;;  %v117_v29 = vsel %vm1132_vm2, %v602_v26, %v601_v27  ;;  %v130_v31 = vsel %vm1193_vm6, %v607_v23, %v606_v24  ;;  %v116_v32 = vsel %vm1132_vm2, %v601_v27, %v602_v26  ;;  %vm960_vm7 = vmand %vm869_vm15, %vm1195_vm1  ;;  %v305_v27 = vld [vmem:[%s1112_s4] sm:$0xff] }
  0x8a   :  { %524 = vmatpush.bf16.msk.msra.mxu1 %vm854_vm4, %v523_v8  ;;  %vm1194_vm4 = vmmov %vm1193_vm6  ;;  %v1197_v35 = vsel %vm960_vm7, 4294967295, %v1196_v35  ;;  %v516_v16 = vpack.c.bf16 %v130_v31, %v117_v29 }
  0x8b   :  { %v129_v33 = vsel %vm1194_vm4, %v606_v24, %v607_v23  ;;  %vm1198_vm6 = vmpackc.low %vm885_vm12, %vm877_vm3 }
  0x8c   :  { %vm1199_vm4 = vmpackc.low %vm916_vm11, %vm906_vm0  ;;  %v529_v36 = vpack.c.bf16 %v129_v33, %v116_v32 }
  0x8d   :  { %514 = vmatpush.bf16.msk.msra.mxu0 %vm1198_vm6, %v513_v34  ;;  %vm1135_vm1 = vmpackc.low %vm843_vm9, %vm944_vm10  ;;  %vm1133_vm6 = vcmask 588800   ;;  %v324_v34 = vstv %s1113_s7 }
  0x8e   :  { %527 = vmatpush.bf16.msk.msra.mxu1 %vm1199_vm4, %v526_v13  ;;  %vm1134_vm2 = vmpackc.low %vm869_vm15, %vm960_vm7 }
  0x91   :  { %517 = vmatpush.bf16.msk.msra.mxu0 %vm1135_vm1, %v516_v16  ;;  %vm1200_vm1 = vcmask 1043456  }
  0x92   :  { %530 = vmatpush.bf16.msk.msra.mxu1 %vm1134_vm2, %v529_v36  ;;  %vm1201_vm7 = vmmov %vm1200_vm1 }
  0x94   :  { %518 = vmatmul.msk.bf16.vlgmr.msra.gmra.mxu0 %vm1133_vm6, %v225_v37 }
  0x95   :  { %531 = vmatmul.msk.bf16.vlgmr.msra.gmra.mxu1 %vm1133_vm6, %v225_v37 }
 0x111   :  { %v246_v38 = vpop.f32.mrf.mxu0 }
 0x112   :  { %v259_v39 = vpop.f32.mrf.mxu1  ;;  %v266_v41 = vmul.f32 %v246_v38, %v246_v38 }
 0x113   :  { %v263_v40 = vadd.f32 %v259_v39, %v246_v38  ;;  %v267_v42 = vmul.f32 %v259_v39, %v259_v39 }
 0x115   :  { %264 = vadd.xlane.f32.xlu2 %v263_v40  ;;  %v268_v43 = vadd.f32 %v267_v42, %v266_v41 }
 0x117   :  { %269 = vadd.xlane.f32.xlu0 %v268_v43 }
 0x119   :  { %v248_v44 = vpop.f32.mrf.mxu0 }
 0x11a   :  { %v261_v45 = vpop.f32.mrf.mxu1 }
 0x188   :  { %v265_v48 = vpop.xlane.xlu2 %264 }
 0x189   :  { %v272_v49 = vrot.slane %v265_v48, 4 }
 0x18a   :  { %v270_v50 = vpop.xlane.xlu0 %269 }
 0x18b   :  { %v274_v51 = vadd.f32 %v272_v49, %v265_v48  ;;  %v276_v53 = vrot.slane %v270_v50, 4 }
 0x18d   :  { %v279_v54 = vmul.f32 0.001953125, %v274_v51  ;;  %v278_v55 = vadd.f32 %v276_v53, %v270_v50 }
 0x18f   :  { %v280_v57 = vmul.f32 0.001953125, %v278_v55  ;;  %v281_v58 = vmul.f32 %v279_v54, %v279_v54  ;;  %v296_v20 = vrot.slane %v279_v54, 4 }
 0x191   :  { %v282_v59 = vsub.f32 %v280_v57, %v281_v58  ;;  %v298_v24 = vsel %vm1201_vm7, %v279_v54, %v296_v20  ;;  %vm1202_vm7 = vcmp.lt.s32.totalorder %v729_v4, 111 }
 0x193   :  { %v283_v60 = vmax.f32 %v282_v59, 0.0 }
 0x195   :  { %v284_v62 = vadd.f32 1e-05, %v283_v60 }
 0x197   :  { %650 = vrsqrt.f32 %v284_v62  ;;  %vm291_vm6 = vweird.f32 %v284_v62 }
 0x19d   :  { %v651_v63 = vpop.eup %650 }
 0x19e   :  { %v286_v2 = vmul.f32 %v651_v63, %v284_v62  ;;  %vm292_vm4 = vweird.f32 %v651_v63 }
 0x19f   :  { %vm293_vm2 = vmor %vm291_vm6, %vm292_vm4  ;;  %vm1204_vm4 = vnez %v1143_v19 }
 0x1a0   :  { %v287_v3 = vmul.f32 %v651_v63, %v286_v2  ;;  %vm1203_vm6 = vmmov %vm1202_vm7 }
 0x1a2   :  { %v288_v7 = vmul.f32 0.5, %v287_v3 }
 0x1a4   :  { %v289_v8 = vsub.f32 1.5, %v288_v7 }
 0x1a6   :  { %v290_v10 = vmul.f32 %v651_v63, %v289_v8 }
 0x1a8   :  { %v294_v12 = vsel %vm293_vm2, %v651_v63, %v290_v10 }
 0x1a9   :  { %v300_v14 = vrot.slane %v294_v12, 4 }
 0x1ab   :  { %v302_v21 = vsel %vm1200_vm1, %v294_v12, %v300_v14 }
 0x1ac   :  { %v304_v23 = vmul.f32 %v303_v18, %v302_v21 }
 0x1ae   :  { %310 = vperm.xlu1 %608, %v304_v23   ;;  %v306_v26 = vmul.f32 %v304_v23, %v298_v24 }
 0x1b0   :  { %v307_v29 = vsub.f32 %v305_v27, %v306_v26 }
 0x1b6   :  { %317 = vperm.xlu1 %608, %v307_v29  }
 0x220   :  { %v311_v31 = vpop.permute.xlu1 %310 }
 0x221   :  { %v313_v32 = vmul.f32 %v311_v31, %v246_v38  ;;  %v314_v33 = vmul.f32 %v311_v31, %v259_v39 }
 0x228   :  { %v318_v13 = vpop.permute.xlu1 %317 }
 0x229   :  { %v320_v16 = vadd.f32 %v318_v13, %v313_v32  ;;  %v321_v36 = vadd.f32 %v318_v13, %v314_v33 }
 0x22b   :  { %vm322_vm2 = vcmp.gt.f32.partialorder %v320_v16, 0.0  ;;  %vm323_vm1 = vcmp.gt.f32.partialorder %v321_v36, 0.0  ;;  %v325_v37 = vmul.f32 %v324_v34, %v320_v16  ;;  %v326_v40 = vmul.f32 %v324_v34, %v321_v36 }
 0x22d   :  { %v327_v41 = vsel %vm322_vm2, %v320_v16, %v325_v37  ;;  %v328_v42 = vsel %vm323_vm1, %v321_v36, %v326_v40  ;;  %vm1205_vm2 = vnez %v1147_v25  ;;  %vm1206_vm1 = vcmask 1043456  }
 0x22e   :  { %v634_v43 = vpack.i.bf16 %v328_v42, %v327_v41  ;;  %vm1207_vm15 = vmmov %vm1206_vm1 }
 0x230   :  { %635 = vrot.lane.b32.xlu0 %v634_v43, %s659_s0  ;;  %625 = vrot.lane.b32.xlu2 %v634_v43, %s658_s13 }
 0x231   :  { %610 = vrot.lane.b32.xlu1 %v634_v43, %s654_s9 }
 0x239   :  { %615 = vrot.lane.b32.xlu1 %v634_v43, %s657_s12 }
 0x241   :  { %620 = vrot.lane.b32.xlu1 %v634_v43, %s655_s10 }
 0x249   :  { %630 = vrot.lane.b32.xlu1 %v634_v43, %s656_s11 }
 0x251   :  { %640 = vrot.lane.b32.xlu1 %v634_v43, %s661_s15 }
 0x259   :  { %645 = vrot.lane.b32.xlu1 %v634_v43, %s660_s14 }
 0x28a   :  { %v626_v57 = vpop.permute.xlu2 %625 }
 0x28b   :  { %v628_v62 = vunpack.i.h.bf16 %v626_v57  ;;  %v627_v63 = vunpack.i.l.bf16 %v626_v57 }
 0x2a2   :  { %v636_v10 = vpop.permute.xlu0 %635 }
 0x2a3   :  { %v611_v38 = vpop.permute.xlu1 %610  ;;  %v638_v21 = vunpack.i.h.bf16 %v636_v10  ;;  %v637_v23 = vunpack.i.l.bf16 %v636_v10 }
 0x2a4   :  { %v613_v39 = vunpack.i.h.bf16 %v611_v38  ;;  %v612_v44 = vunpack.i.l.bf16 %v611_v38 }
 0x2a6   :  { %v389_v45 = vsel %vm1202_vm7, %v612_v44, %v613_v39  ;;  %v390_v47 = vsel %vm1203_vm6, %v613_v39, %v612_v44  ;;  %vm1208_vm7 = vcmp.lt.s32.totalorder %v729_v4, 113  ;;  %vm1209_vm6 = vcmp.lt.s32.totalorder %v729_v4, 112 }
 0x2a7   :  { %v391_v48 = vsel %vm1204_vm4, %v389_v45, 0.0  ;;  %v392_v49 = vsel %vm1205_vm2, %v390_v47, 0.0  ;;  %vm1210_vm4 = vmmov %vm1208_vm7  ;;  %vm1212_vm2 = vcmp.lt.s32.totalorder %v729_v4, 127 }
 0x2a8   :  { %v401_v50 = vpack.c.bf16 %v391_v48, %v391_v48  ;;  %v402_v51 = vpack.c.bf16 %v392_v49, %v392_v49  ;;  %v365_v18 = vsel %vm1212_vm2, %v627_v63, %v628_v62 }
 0x2a9   :  { %v536_v26 = vpack.c.bf16 %v365_v18, %v327_v41  ;;  %v403_v41 = vld [vmem:[%s1114_s2] sm:$0xf] }
 0x2aa   :  { %v408_v53 = vsel %vm1206_vm1, %v401_v50, 0  ;;  %v411_v54 = vsel %vm1207_vm15, %v402_v51, 0  ;;  %vm1211_vm15 = vmmov %vm1209_vm6  ;;  %v481_v18 = vld [vmem:[%s1116_s6] sm:$0xff] }
 0x2ab   :  { %v616_v55 = vpop.permute.xlu1 %615  ;;  %416 = vmatpush.bf16.msra.mxu2 %v408_v53  ;;  %429 = vmatpush.bf16.msra.mxu3 %v411_v54  ;;  %vm1213_vm1 = vmmov %vm1212_vm2 }
 0x2ac   :  { %v618_v58 = vunpack.i.h.bf16 %v616_v55  ;;  %v617_v59 = vunpack.i.l.bf16 %v616_v55  ;;  %v366_v20 = vsel %vm1213_vm1, %v628_v62, %v627_v63  ;;  %vm1223_vm1 = vmpackc.low %vm916_vm11, %vm906_vm0  ;;  %vm1229_vm11 = vnez %v1173_v61 }
 0x2ad   :  { %v549_v27 = vpack.c.bf16 %v366_v20, %v328_v42  ;;  %vm1228_vm0 = vmpackc.low %vm843_vm9, %vm944_vm10 }
 0x2ae   :  { %v373_v25 = vsel %vm1208_vm7, %v617_v59, %v618_v58  ;;  %v374_v7 = vsel %vm1210_vm4, %v618_v58, %v617_v59  ;;  %vm1214_vm7 = vmpackc.low %vm741_vm5, %vm768_vm13  ;;  %vm1218_vm5 = vcmp.lt.s32.totalorder %v729_v4, 15  ;;  %vm1219_vm13 = vcmp.lt.s32.totalorder %v729_v4, 1 }
 0x2af   :  { %v358_v17 = vsel %vm1219_vm13, %v638_v21, %v637_v23  ;;  %vm1221_vm2 = vmmov %vm1219_vm13 }
 0x2b3   :  { %v621_v60 = vpop.permute.xlu1 %620 }
 0x2b4   :  { %v623_v19 = vunpack.i.h.bf16 %v621_v60  ;;  %v622_v2 = vunpack.i.l.bf16 %v621_v60 }
 0x2b6   :  { %v381_v3 = vsel %vm1209_vm6, %v622_v2, %v623_v19  ;;  %v382_v8 = vsel %vm1211_vm15, %v623_v19, %v622_v2  ;;  %vm1215_vm6 = vnez %v1151_v30  ;;  %vm1217_vm15 = vnez %v1165_v56 }
 0x2b7   :  { %v533_v12 = vpack.c.bf16 %v381_v3, %v373_v25  ;;  %v546_v14 = vpack.c.bf16 %v382_v8, %v374_v7  ;;  %vm1216_vm4 = vmpackc.low %vm749_vm8, %vm1215_vm6  ;;  %v357_v30 = vsel %vm1221_vm2, %v637_v23, %v638_v21  ;;  %vm1225_vm6 = vcmp.lt.s32.totalorder %v729_v4, 16  ;;  %v479_v3 = vld [vmem:[%s1115_s5] sm:$0xff] }
 0x2b8   :  { %vm1220_vm8 = vmmov %vm1218_vm5  ;;  %vm1234_vm2 = vcmask 1043456  }
 0x2b9   :  { %534 = vmatpush.bf16.msk.msra.mxu2 %vm1214_vm7, %v533_v12  ;;  %547 = vmatpush.bf16.msk.msra.mxu3 %vm1216_vm4, %v546_v14  ;;  %vm1224_vm7 = vcmp.lt.s32.totalorder %v729_v4, 17  ;;  %vm1230_vm4 = vnez %v1197_v35 }
 0x2bb   :  { %v631_v24 = vpop.permute.xlu1 %630 }
 0x2bc   :  { %v633_v29 = vunpack.i.h.bf16 %v631_v24  ;;  %v632_v31 = vunpack.i.l.bf16 %v631_v24 }
 0x2bd   :  { %537 = vmatpush.bf16.msk.msra.mxu2 %vm1189_vm14, %v536_v26  ;;  %550 = vmatpush.bf16.msk.msra.mxu3 %vm1217_vm15, %v549_v27  ;;  %vm1222_vm14 = vmpackc.low %vm885_vm12, %vm877_vm3 }
 0x2be   :  { %v350_v15 = vsel %vm1218_vm5, %v633_v29, %v632_v31  ;;  %v349_v22 = vsel %vm1220_vm8, %v632_v31, %v633_v29  ;;  %vm1226_vm3 = vmmov %vm1224_vm7  ;;  %vm1232_vm5 = vcmask 588800  }
 0x2bf   :  { %v539_v32 = vpack.c.bf16 %v358_v17, %v350_v15  ;;  %v552_v33 = vpack.c.bf16 %v357_v30, %v349_v22  ;;  %vm1227_vm12 = vmmov %vm1225_vm6 }
 0x2c0   :  { %vm1231_vm15 = vmpackc.low %vm1229_vm11, %vm1230_vm4 }
 0x2c1   :  { %540 = vmatpush.bf16.msk.msra.mxu2 %vm1222_vm14, %v539_v32  ;;  %553 = vmatpush.bf16.msk.msra.mxu3 %vm1223_vm1, %v552_v33  ;;  %vm1233_vm13 = vmmov %vm1232_vm5 }
 0x2c2   :  { %vm1235_vm14 = vmmov %vm1234_vm2 }
 0x2c3   :  { %v641_v46 = vpop.permute.xlu1 %640 }
 0x2c4   :  { %v643_v56 = vunpack.i.h.bf16 %v641_v46  ;;  %v642_v34 = vunpack.i.l.bf16 %v641_v46 }
 0x2c6   :  { %v334_v37 = vsel %vm1224_vm7, %v643_v56, %v642_v34  ;;  %v333_v6 = vsel %vm1226_vm3, %v642_v34, %v643_v56 }
 0x2cb   :  { %v646_v13 = vpop.permute.xlu1 %645 }
 0x2cc   :  { %v648_v16 = vunpack.i.h.bf16 %v646_v13  ;;  %v647_v36 = vunpack.i.l.bf16 %v646_v13 }
 0x2ce   :  { %v342_v5 = vsel %vm1225_vm6, %v648_v16, %v647_v36  ;;  %v341_v9 = vsel %vm1227_vm12, %v647_v36, %v648_v16 }
 0x2cf   :  { %v542_v11 = vpack.c.bf16 %v342_v5, %v334_v37  ;;  %v555_v40 = vpack.c.bf16 %v341_v9, %v333_v6 }
 0x2d1   :  { %543 = vmatpush.bf16.msk.msra.mxu2 %vm1228_vm0, %v542_v11  ;;  %556 = vmatpush.bf16.msk.msra.mxu3 %vm1231_vm15, %v555_v40 }
 0x2d4   :  { %544 = vmatmul.msk.bf16.vlgmr.msra.gmra.mxu2 %vm1232_vm5, %v403_v41  ;;  %557 = vmatmul.msk.bf16.vlgmr.msra.gmra.mxu3 %vm1233_vm13, %v403_v41 }
 0x357   :  { %v422_v4 = vpop.f32.mrf.mxu2  ;;  %v435_v52 = vpop.f32.mrf.mxu3 }
 0x358   :  { %v439_v42 = vadd.f32 %v435_v52, %v422_v4  ;;  %v442_v28 = vmul.f32 %v422_v4, %v422_v4  ;;  %v443_v43 = vmul.f32 %v435_v52, %v435_v52 }
 0x35a   :  { %440 = vadd.xlane.f32.xlu2 %v439_v42  ;;  %v444_v38 = vadd.f32 %v443_v43, %v442_v28 }
 0x35c   :  { %445 = vadd.xlane.f32.xlu0 %v444_v38 }
 0x35f   :  { %v424_v61 = vpop.f32.mrf.mxu2  ;;  %v437_v35 = vpop.f32.mrf.mxu3 }
 0x3cd   :  { %v441_v39 = vpop.xlane.xlu2 %440 }
 0x3ce   :  { %v448_v44 = vrot.slane %v441_v39, 4 }
 0x3cf   :  { %v446_v45 = vpop.xlane.xlu0 %445 }
 0x3d0   :  { %v450_v47 = vadd.f32 %v448_v44, %v441_v39  ;;  %v452_v48 = vrot.slane %v446_v45, 4 }
 0x3d2   :  { %v455_v49 = vmul.f32 0.001953125, %v450_v47  ;;  %v454_v50 = vadd.f32 %v452_v48, %v446_v45 }
 0x3d4   :  { %v456_v51 = vmul.f32 0.001953125, %v454_v50  ;;  %v457_v53 = vmul.f32 %v455_v49, %v455_v49  ;;  %v472_v7 = vrot.slane %v455_v49, 4 }
 0x3d6   :  { %v458_v54 = vsub.f32 %v456_v51, %v457_v53  ;;  %v474_v12 = vsel %vm1235_vm14, %v455_v49, %v472_v7 }
 0x3d8   :  { %v459_v55 = vmax.f32 %v458_v54, 0.0 }
 0x3da   :  { %v460_v57 = vadd.f32 1e-05, %v459_v55 }
 0x3dc   :  { %652 = vrsqrt.f32 %v460_v57  ;;  %vm467_vm10 = vweird.f32 %v460_v57 }
 0x3e2   :  { %v653_v58 = vpop.eup %652 }
 0x3e3   :  { %v462_v59 = vmul.f32 %v653_v58, %v460_v57  ;;  %vm468_vm9 = vweird.f32 %v653_v58 }
 0x3e4   :  { %vm469_vm8 = vmor %vm467_vm10, %vm468_vm9 }
 0x3e5   :  { %v463_v60 = vmul.f32 %v653_v58, %v462_v59 }
 0x3e7   :  { %v464_v62 = vmul.f32 0.5, %v463_v60 }
 0x3e9   :  { %v465_v63 = vsub.f32 1.5, %v464_v62 }
 0x3eb   :  { %v466_v19 = vmul.f32 %v653_v58, %v465_v63 }
 0x3ed   :  { %v470_v2 = vsel %vm469_vm8, %v653_v58, %v466_v19 }
 0x3ee   :  { %v476_v25 = vrot.slane %v470_v2, 4 }
 0x3f0   :  { %v478_v8 = vsel %vm1234_vm2, %v470_v2, %v476_v25 }
 0x3f1   :  { %v480_v10 = vmul.f32 %v479_v3, %v478_v8 }
 0x3f3   :  { %486 = vperm.xlu1 %608, %v480_v10   ;;  %v482_v14 = vmul.f32 %v480_v10, %v474_v12 }
 0x3f5   :  { %v483_v20 = vsub.f32 %v481_v18, %v482_v14 }
 0x3fb   :  { %493 = vperm.xlu1 %608, %v483_v20  }
 0x465   :  { %v487_v21 = vpop.permute.xlu1 %486 }
 0x466   :  { %v489_v23 = vmul.f32 %v487_v21, %v422_v4  ;;  %v490_v24 = vmul.f32 %v487_v21, %v435_v52 }
 0x46d   :  { %v494_v26 = vpop.permute.xlu1 %493 }
 0x46e   :  { %v496_v27 = vadd.f32 %v494_v26, %v489_v23  ;;  %v497_v29 = vadd.f32 %v494_v26, %v490_v24 }
 0x470   :  { %v498_v31 = vadd.f32 %v496_v27, %v712_v0  ;;  %v499_v15 = vadd.f32 %v497_v29, %v717_v1 }
 0x472   :  { %500 = vst [vmem:[%s1117_s8] sm:$0xff] %v498_v31 }
 0x473   :  { %501 = vst [vmem:[%s1117_s8 + $0x8] sm:$0xff] %v499_v15 }

</bundles_post_ra>
